<compile_context>
chip_gen: v5e
topology: v5e:2x2
jax: 0.10.0
libtpu: 0.0.40
codegen_flags: <defaults>
</compile_context>

<pallas_src>
import functools
import math

import jax
import jax.numpy as jnp
from jax.experimental import pallas as pl
from jax.experimental.pallas import tpu as pltpu


# ---------------------------------------------------------------------------
# Kernel 1: LayerNorm1 + Q / K / V projections (softmax scale folded into Wq).
# ---------------------------------------------------------------------------
def _ln_qkv_kernel(x_ref, g1_ref, b1_ref, wq_ref, wk_ref, wv_ref,
                   q_ref, k_ref, v_ref, *, eps):
    x = x_ref[0].astype(jnp.float32)                       # (tr, C)
    mu = jnp.mean(x, axis=-1, keepdims=True)
    xc = x - mu
    var = jnp.mean(xc * xc, axis=-1, keepdims=True)
    xn = xc * jax.lax.rsqrt(var + eps) * g1_ref[...] + b1_ref[...]
    xn_b = xn.astype(jnp.bfloat16)                         # bf16 MXU operands
    q_ref[0] = jnp.dot(xn_b, wq_ref[...],
                       preferred_element_type=jnp.float32).astype(q_ref.dtype)
    k_ref[0] = jnp.dot(xn_b, wk_ref[...],
                       preferred_element_type=jnp.float32).astype(k_ref.dtype)
    v_ref[0] = jnp.dot(xn_b, wv_ref[...],
                       preferred_element_type=jnp.float32).astype(v_ref.dtype)


# ---------------------------------------------------------------------------
# Kernel 2: flash attention (online softmax over the kv grid axis).
# ---------------------------------------------------------------------------
def _flash_attn_kernel(q_ref, k_ref, v_ref, o_ref, m_sc, l_sc, acc_sc):
    kv = pl.program_id(3)

    @pl.when(kv == 0)
    def _():
        m_sc[...] = jnp.full_like(m_sc, -jnp.inf)
        l_sc[...] = jnp.zeros_like(l_sc)
        acc_sc[...] = jnp.zeros_like(acc_sc)

    q = q_ref[0, 0]                                        # (bq, d) bf16, pre-scaled
    k = k_ref[0, 0]                                        # (bk, d) bf16
    v = v_ref[0, 0]                                        # (bk, d) bf16

    # s = q @ k^T  (scale already folded into Wq), fp32 accumulation on the MXU.
    s = jax.lax.dot_general(q, k, (((1,), (1,)), ((), ())),
                            preferred_element_type=jnp.float32)   # (bq, bk)

    m_prev = m_sc[...]
    m_new = jnp.maximum(m_prev, jnp.max(s, axis=-1, keepdims=True))
    alpha = jnp.exp(m_prev - m_new)
    p = jnp.exp(s - m_new)
    l_sc[...] = alpha * l_sc[...] + jnp.sum(p, axis=-1, keepdims=True)
    acc_sc[...] = alpha * acc_sc[...] + jnp.dot(
        p.astype(jnp.bfloat16), v, preferred_element_type=jnp.float32)
    m_sc[...] = m_new

    @pl.when(kv == pl.num_programs(3) - 1)
    def _():
        inv_l = pl.reciprocal(l_sc[...], approx=True)      # EUP slot
        o_ref[0, 0] = (acc_sc[...] * inv_l).astype(o_ref.dtype)


# ---------------------------------------------------------------------------
# Kernel 3: attention output proj + residual + LayerNorm2 + MLP + residual.
# ---------------------------------------------------------------------------
def _proj_mlp_kernel(x_ref, ctx_ref, wp_ref, bp_ref, g2_ref, beta2_ref,
                     w1_ref, bias1_ref, w2_ref, bias2_ref, o_ref, *, eps):
    x = x_ref[0].astype(jnp.float32)                       # (tr, C) block input
    ctx = ctx_ref[0]                                       # (tr, C) bf16 attn context

    attn_out = jnp.dot(ctx, wp_ref[...],
                       preferred_element_type=jnp.float32) + bp_ref[...]
    h = x + attn_out                                       # residual 1

    mu = jnp.mean(h, axis=-1, keepdims=True)
    hc = h - mu
    var = jnp.mean(hc * hc, axis=-1, keepdims=True)
    hn = hc * jax.lax.rsqrt(var + eps) * g2_ref[...] + beta2_ref[...]

    h1 = jnp.dot(hn.astype(jnp.bfloat16), w1_ref[...],
                 preferred_element_type=jnp.float32) + bias1_ref[...]
    # TODO(synk): nn.GELU default is exact erf GELU; tanh approximation used here
    #             (guaranteed Mosaic lowering), numerical difference < 3e-3.
    h1 = jax.nn.gelu(h1, approximate=True)
    h2 = jnp.dot(h1.astype(jnp.bfloat16), w2_ref[...],
                 preferred_element_type=jnp.float32) + bias2_ref[...]

    o_ref[0] = (h + h2).astype(o_ref.dtype)                # residual 2


# ---------------------------------------------------------------------------
# Wrapper
# ---------------------------------------------------------------------------
def _pick_tile(n, cap=128):
    """Largest multiple-of-8 divisor of n that is <= cap (or n itself if n <= cap)."""
    if n <= cap:
        return n
    t = (cap // 8) * 8
    while t >= 8:
        if n % t == 0:
            return t
        t -= 8
    return n


def pvt_block(x, H, W, params, *, num_heads, eps=1e-5,
              block_rows=None, block_q=None, block_k=None):
    """PVT Block forward (eval): x + Attn(LN1(x)) then + MLP(LN2(.)).

    x: (B, N, C).  Linear weights stored (in, out): y = x @ W + b.
    """
    del H, W  # MSA Attention never uses the spatial dims (sr_ratio=1 path).
    B, N, C = x.shape
    assert C % num_heads == 0
    d = C // num_heads
    scale = d ** (-0.5)
    hidden = params["w1"].shape[1]

    tr = block_rows or _pick_tile(N, cap=256)
    bq = block_q or _pick_tile(N, cap=256)
    bk = block_k or _pick_tile(N, cap=256)
    assert N % tr == 0 and N % bq == 0 and N % bk == 0

    f32, bf16 = jnp.float32, jnp.bfloat16
    gamma1 = params["gamma1"].reshape(1, C).astype(f32)
    beta1 = params["beta1"].reshape(1, C).astype(f32)
    gamma2 = params["gamma2"].reshape(1, C).astype(f32)
    beta2 = params["beta2"].reshape(1, C).astype(f32)
    wq = (params["wq"] * scale).astype(bf16)      # fold softmax scale into Wq
    wk = params["wkv"][:, :C].astype(bf16)
    wv = params["wkv"][:, C:].astype(bf16)
    wproj = params["wproj"].astype(bf16)
    bproj = params["bproj"].reshape(1, C).astype(f32)
    w1 = params["w1"].astype(bf16)
    b1 = params["b1"].reshape(1, hidden).astype(f32)
    w2 = params["w2"].astype(bf16)
    b2 = params["b2"].reshape(1, C).astype(f32)

    row_cparams = pltpu.CompilerParams(
        dimension_semantics=("parallel", "parallel"),
        vmem_limit_bytes=64 * 1024 * 1024)

    # ---- 1) LayerNorm1 + Q/K/V projections --------------------------------
    q, k, v = pl.pallas_call(
        functools.partial(_ln_qkv_kernel, eps=eps),
        out_shape=tuple(jax.ShapeDtypeStruct((B, N, C), bf16) for _ in range(3)),
        grid_spec=pltpu.PrefetchScalarGridSpec(
            num_scalar_prefetch=0,
            grid=(B, N // tr),
            in_specs=[
                pl.BlockSpec((1, tr, C), lambda b, i: (b, i, 0)),   # x
                pl.BlockSpec((1, C), lambda b, i: (0, 0)),          # gamma1
                pl.BlockSpec((1, C), lambda b, i: (0, 0)),          # beta1
                pl.BlockSpec((C, C), lambda b, i: (0, 0)),          # Wq (pre-scaled)
                pl.BlockSpec((C, C), lambda b, i: (0, 0)),          # Wk
                pl.BlockSpec((C, C), lambda b, i: (0, 0)),          # Wv
            ],
            out_specs=[pl.BlockSpec((1, tr, C), lambda b, i: (b, i, 0))] * 3,
        ),
        compiler_params=row_cparams,
    )(x, gamma1, beta1, wq, wk, wv)

    # Head split is wrapper-side layout plumbing (no in-kernel transposes).
    qh = q.reshape(B, N, num_heads, d).transpose(0, 2, 1, 3)
    kh = k.reshape(B, N, num_heads, d).transpose(0, 2, 1, 3)
    vh = v.reshape(B, N, num_heads, d).transpose(0, 2, 1, 3)

    # ---- 2) Flash attention ------------------------------------------------
    nq, nk = N // bq, N // bk
    cost = pl.CostEstimate(
        flops=4 * B * num_heads * N * N * d,
        transcendentals=B * num_heads * N * N,
        bytes_accessed=2 * (3 * B * N * C + B * N * C))     # bf16 q,k,v in + ctx out

    ctx = pl.pallas_call(
        _flash_attn_kernel,
        out_shape=jax.ShapeDtypeStruct((B, num_heads, N, d), bf16),
        grid_spec=pltpu.PrefetchScalarGridSpec(
            num_scalar_prefetch=0,
            grid=(B, num_heads, nq, nk),
            in_specs=[
                pl.BlockSpec((1, 1, bq, d), lambda b, h, i, j: (b, h, i, 0)),
                pl.BlockSpec((1, 1, bk, d), lambda b, h, i, j: (b, h, j, 0)),
                pl.BlockSpec((1, 1, bk, d), lambda b, h, i, j: (b, h, j, 0)),
            ],
            out_specs=pl.BlockSpec((1, 1, bq, d), lambda b, h, i, j: (b, h, i, 0)),
            scratch_shapes=[
                pltpu.VMEM((bq, 1), jnp.float32),   # running max m
                pltpu.VMEM((bq, 1), jnp.float32),   # running sum l
                pltpu.VMEM((bq, d), jnp.float32),   # output accumulator
            ],
        ),
        compiler_params=pltpu.CompilerParams(
            dimension_semantics=("parallel", "parallel", "parallel", "arbitrary"),
            vmem_limit_bytes=64 * 1024 * 1024),
        cost_estimate=cost,
    )(qh, kh, vh)

    ctx = ctx.transpose(0, 2, 1, 3).reshape(B, N, C)   # merge heads (XLA side)

    # ---- 3) proj + residual + LN2 + MLP + residual -------------------------
    out = pl.pallas_call(
        functools.partial(_proj_mlp_kernel, eps=eps),
        out_shape=jax.ShapeDtypeStruct((B, N, C), x.dtype),
        grid_spec=pltpu.PrefetchScalarGridSpec(
            num_scalar_prefetch=0,
            grid=(B, N // tr),
            in_specs=[
                pl.BlockSpec((1, tr, C), lambda b, i: (b, i, 0)),    # x (residual)
                pl.BlockSpec((1, tr, C), lambda b, i: (b, i, 0)),    # attn context
                pl.BlockSpec((C, C), lambda b, i: (0, 0)),           # Wproj
                pl.BlockSpec((1, C), lambda b, i: (0, 0)),           # bproj
                pl.BlockSpec((1, C), lambda b, i: (0, 0)),           # gamma2
                pl.BlockSpec((1, C), lambda b, i: (0, 0)),           # beta2
                pl.BlockSpec((C, hidden), lambda b, i: (0, 0)),      # W1
                pl.BlockSpec((1, hidden), lambda b, i: (0, 0)),      # b1
                pl.BlockSpec((hidden, C), lambda b, i: (0, 0)),      # W2
                pl.BlockSpec((1, C), lambda b, i: (0, 0)),           # b2
            ],
            out_specs=pl.BlockSpec((1, tr, C), lambda b, i: (b, i, 0)),
        ),
        compiler_params=row_cparams,
    )(x, ctx, wproj, bproj, gamma2, beta2, w1, b1, w2, b2)

    return out


# ---------------------------------------------------------------------------
# Pure-JAX reference (fp32) mirroring the PyTorch Block forward in eval mode.
# ---------------------------------------------------------------------------
def _block_reference(x, p, *, num_heads, eps=1e-5):
    B, N, C = x.shape
    d = C // num_heads
    scale = d ** (-0.5)

    def ln(z, g, b):
        mu = z.mean(-1, keepdims=True)
        var = ((z - mu) ** 2).mean(-1, keepdims=True)
        return (z - mu) / jnp.sqrt(var + eps) * g + b

    xn = ln(x, p["gamma1"], p["beta1"])
    q = (xn @ p["wq"]).reshape(B, N, num_heads, d).transpose(0, 2, 1, 3)
    kv = (xn @ p["wkv"]).reshape(B, N, 2, num_heads, d).transpose(2, 0, 3, 1, 4)
    k, v = kv[0], kv[1]
    attn = jax.nn.softmax(jnp.einsum("bhqd,bhkd->bhqk", q, k) * scale, axis=-1)
    ctx = jnp.einsum("bhqk,bhkd->bhqd", attn, v).transpose(0, 2, 1, 3).reshape(B, N, C)
    h = x + ctx @ p["wproj"] + p["bproj"]
    hn = ln(h, p["gamma2"], p["beta2"])
    m = jax.nn.gelu(hn @ p["w1"] + p["b1"], approximate=False) @ p["w2"] + p["b2"]
    return h + m


if __name__ == "__main__":
    # Small PVT-like shapes: dim=C tokens from an 8x8 feature map, 4 heads, mlp_ratio=4.
    B, Hs, Ws, C = 2, 8, 8, 32
    N = Hs * Ws
    num_heads = 4
    hidden = int(C * 4.0)

    key = jax.random.PRNGKey(0)
    ks = jax.random.split(key, 12)
    x = jax.random.normal(ks[0], (B, N, C), dtype=jnp.float32)
    params = dict(
        gamma1=1.0 + 0.1 * jax.random.normal(ks[1], (1, C), jnp.float32),
        beta1=0.05 * jax.random.normal(ks[2], (1, C), jnp.float32),
        wq=jax.random.normal(ks[3], (C, C), jnp.float32) / math.sqrt(C),
        wkv=jax.random.normal(ks[4], (C, 2 * C), jnp.float32) / math.sqrt(C),
        wproj=jax.random.normal(ks[5], (C, C), jnp.float32) / math.sqrt(C),
        bproj=0.02 * jax.random.normal(ks[6], (1, C), jnp.float32),
        gamma2=1.0 + 0.1 * jax.random.normal(ks[7], (1, C), jnp.float32),
        beta2=0.05 * jax.random.normal(ks[8], (1, C), jnp.float32),
        w1=jax.random.normal(ks[9], (C, hidden), jnp.float32) / math.sqrt(C),
        b1=0.02 * jax.random.normal(ks[10], (1, hidden), jnp.float32),
        w2=jax.random.normal(ks[11], (hidden, C), jnp.float32) / math.sqrt(hidden),
        b2=jnp.zeros((1, C), jnp.float32),
    )

    # Small explicit tiles so the flash-attention kv loop (online softmax) and the
    # multi-step row grids are actually exercised at this toy size.
    out = pvt_block(x, Hs, Ws, params, num_heads=num_heads,
                    block_rows=32, block_q=32, block_k=32)
    out = jax.block_until_ready(out)

    ref = _block_reference(x, params, num_heads=num_heads)
    assert out.shape == (B, N, C)
    max_err = float(jnp.max(jnp.abs(out - ref)))
    assert jnp.allclose(out, ref, atol=5e-2, rtol=5e-2), (
        f"mismatch vs reference (max abs err {max_err})")

    print("KERNEL_OK")
</pallas_src>

<mosaic_0001>
module attributes {stable_mosaic.version = 11 : i64} {
  func.func @_ln_qkv_kernel(%arg0: i32, %arg1: i32, %arg2: memref<1x32x32xf32, #tpu.memory_space<vmem>>, %arg3: memref<1x32xf32, #tpu.memory_space<vmem>>, %arg4: memref<1x32xf32, #tpu.memory_space<vmem>>, %arg5: memref<32x32xbf16, #tpu.memory_space<vmem>>, %arg6: memref<32x32xbf16, #tpu.memory_space<vmem>>, %arg7: memref<32x32xbf16, #tpu.memory_space<vmem>>, %arg8: memref<1x32x32xbf16, #tpu.memory_space<vmem>>, %arg9: memref<1x32x32xbf16, #tpu.memory_space<vmem>>, %arg10: memref<1x32x32xbf16, #tpu.memory_space<vmem>>) attributes {dimension_semantics = [#tpu.dimension_semantics<parallel>, #tpu.dimension_semantics<parallel>], iteration_bounds = array<i64: 2, 2>, scalar_prefetch = 0 : i64, scratch_operands = 0 : i64, tpu.core_type = #tpu.core_type<tc>, window_params = [{transform_indices = @transform_0, window_bounds = array<i64: 1, 32, 32>}, {pipeline_mode = #tpu.pipeline_mode<synchronous>, transform_indices = @transform_1, window_bounds = array<i64: 1, 32>}, {pipeline_mode = #tpu.pipeline_mode<synchronous>, transform_indices = @transform_2, window_bounds = array<i64: 1, 32>}, {pipeline_mode = #tpu.pipeline_mode<synchronous>, transform_indices = @transform_3, window_bounds = array<i64: 32, 32>}, {pipeline_mode = #tpu.pipeline_mode<synchronous>, transform_indices = @transform_4, window_bounds = array<i64: 32, 32>}, {pipeline_mode = #tpu.pipeline_mode<synchronous>, transform_indices = @transform_5, window_bounds = array<i64: 32, 32>}, {transform_indices = @transform_6, window_bounds = array<i64: 1, 32, 32>}, {transform_indices = @transform_7, window_bounds = array<i64: 1, 32, 32>}, {transform_indices = @transform_8, window_bounds = array<i64: 1, 32, 32>}]} {
    %c0 = arith.constant 0 : index
    %c0_0 = arith.constant 0 : index
    %c0_1 = arith.constant 0 : index
    %0 = vector.load %arg2[%c0, %c0_0, %c0_1] : memref<1x32x32xf32, #tpu.memory_space<vmem>>, vector<1x32x32xf32>
    %1 = vector.shape_cast %0 : vector<1x32x32xf32> to vector<32x32xf32>
    %cst = arith.constant dense<0.000000e+00> : vector<32xf32>
    %2 = vector.multi_reduction <add>, %1, %cst [1] : vector<32x32xf32> to vector<32xf32>
    %3 = vector.shape_cast %2 : vector<32xf32> to vector<32x1xf32>
    %cst_2 = arith.constant 3.200000e+01 : f32
    %4 = vector.broadcast %cst_2 : f32 to vector<32x1xf32>
    %5 = arith.divf %3, %4 : vector<32x1xf32>
    %6 = vector.broadcast %5 : vector<32x1xf32> to vector<32x32xf32>
    %7 = arith.subf %1, %6 : vector<32x32xf32>
    %8 = arith.mulf %7, %7 : vector<32x32xf32>
    %cst_3 = arith.constant dense<0.000000e+00> : vector<32xf32>
    %9 = vector.multi_reduction <add>, %8, %cst_3 [1] : vector<32x32xf32> to vector<32xf32>
    %10 = vector.shape_cast %9 : vector<32xf32> to vector<32x1xf32>
    %cst_4 = arith.constant 3.200000e+01 : f32
    %11 = vector.broadcast %cst_4 : f32 to vector<32x1xf32>
    %12 = arith.divf %10, %11 : vector<32x1xf32>
    %cst_5 = arith.constant 9.99999974E-6 : f32
    %13 = vector.broadcast %cst_5 : f32 to vector<32x1xf32>
    %14 = arith.addf %12, %13 : vector<32x1xf32>
    %15 = math.rsqrt %14 : vector<32x1xf32>
    %16 = vector.broadcast %15 : vector<32x1xf32> to vector<32x32xf32>
    %17 = arith.mulf %7, %16 : vector<32x32xf32>
    %c0_6 = arith.constant 0 : index
    %c0_7 = arith.constant 0 : index
    %18 = vector.load %arg3[%c0_6, %c0_7] : memref<1x32xf32, #tpu.memory_space<vmem>>, vector<1x32xf32>
    %19 = vector.broadcast %18 : vector<1x32xf32> to vector<32x32xf32>
    %20 = arith.mulf %17, %19 : vector<32x32xf32>
    %c0_8 = arith.constant 0 : index
    %c0_9 = arith.constant 0 : index
    %21 = vector.load %arg4[%c0_8, %c0_9] : memref<1x32xf32, #tpu.memory_space<vmem>>, vector<1x32xf32>
    %22 = vector.broadcast %21 : vector<1x32xf32> to vector<32x32xf32>
    %23 = arith.addf %20, %22 : vector<32x32xf32>
    %24 = arith.truncf %23 : vector<32x32xf32> to vector<32x32xbf16>
    %c0_10 = arith.constant 0 : index
    %c0_11 = arith.constant 0 : index
    %25 = vector.load %arg5[%c0_10, %c0_11] : memref<32x32xbf16, #tpu.memory_space<vmem>>, vector<32x32xbf16>
    %cst_12 = arith.constant dense<0.000000e+00> : vector<32x32xf32>
    %26 = tpu.matmul %24, %25, %cst_12 {dimension_numbers = #tpu.dot_dimension_numbers<[1], [0], [0], [1], [0, 0, 1, 1], [], []>} : vector<32x32xbf16>, vector<32x32xbf16>, vector<32x32xf32> -> vector<32x32xf32>
    %27 = arith.truncf %26 : vector<32x32xf32> to vector<32x32xbf16>
    %c0_13 = arith.constant 0 : index
    %c0_14 = arith.constant 0 : index
    %c0_15 = arith.constant 0 : index
    %28 = vector.load %arg8[%c0_13, %c0_14, %c0_15] : memref<1x32x32xbf16, #tpu.memory_space<vmem>>, vector<1x32x32xbf16>
    %29 = vector.shape_cast %28 : vector<1x32x32xbf16> to vector<32x32xbf16>
    %30 = vector.shape_cast %27 : vector<32x32xbf16> to vector<1x32x32xbf16>
    tpu.vector_store %arg8[%c0_13, %c0_14, %c0_15], %30 {strides = array<i32>} : memref<1x32x32xbf16, #tpu.memory_space<vmem>>, vector<1x32x32xbf16>,
    %c0_16 = arith.constant 0 : index
    %c0_17 = arith.constant 0 : index
    %31 = vector.load %arg6[%c0_16, %c0_17] : memref<32x32xbf16, #tpu.memory_space<vmem>>, vector<32x32xbf16>
    %cst_18 = arith.constant dense<0.000000e+00> : vector<32x32xf32>
    %32 = tpu.matmul %24, %31, %cst_18 {dimension_numbers = #tpu.dot_dimension_numbers<[1], [0], [0], [1], [0, 0, 1, 1], [], []>} : vector<32x32xbf16>, vector<32x32xbf16>, vector<32x32xf32> -> vector<32x32xf32>
    %33 = arith.truncf %32 : vector<32x32xf32> to vector<32x32xbf16>
    %c0_19 = arith.constant 0 : index
    %c0_20 = arith.constant 0 : index
    %c0_21 = arith.constant 0 : index
    %34 = vector.load %arg9[%c0_19, %c0_20, %c0_21] : memref<1x32x32xbf16, #tpu.memory_space<vmem>>, vector<1x32x32xbf16>
    %35 = vector.shape_cast %34 : vector<1x32x32xbf16> to vector<32x32xbf16>
    %36 = vector.shape_cast %33 : vector<32x32xbf16> to vector<1x32x32xbf16>
    tpu.vector_store %arg9[%c0_19, %c0_20, %c0_21], %36 {strides = array<i32>} : memref<1x32x32xbf16, #tpu.memory_space<vmem>>, vector<1x32x32xbf16>,
    %c0_22 = arith.constant 0 : index
    %c0_23 = arith.constant 0 : index
    %37 = vector.load %arg7[%c0_22, %c0_23] : memref<32x32xbf16, #tpu.memory_space<vmem>>, vector<32x32xbf16>
    %cst_24 = arith.constant dense<0.000000e+00> : vector<32x32xf32>
    %38 = tpu.matmul %24, %37, %cst_24 {dimension_numbers = #tpu.dot_dimension_numbers<[1], [0], [0], [1], [0, 0, 1, 1], [], []>} : vector<32x32xbf16>, vector<32x32xbf16>, vector<32x32xf32> -> vector<32x32xf32>
    %39 = arith.truncf %38 : vector<32x32xf32> to vector<32x32xbf16>
    %c0_25 = arith.constant 0 : index
    %c0_26 = arith.constant 0 : index
    %c0_27 = arith.constant 0 : index
    %40 = vector.load %arg10[%c0_25, %c0_26, %c0_27] : memref<1x32x32xbf16, #tpu.memory_space<vmem>>, vector<1x32x32xbf16>
    %41 = vector.shape_cast %40 : vector<1x32x32xbf16> to vector<32x32xbf16>
    %42 = vector.shape_cast %39 : vector<32x32xbf16> to vector<1x32x32xbf16>
    tpu.vector_store %arg10[%c0_25, %c0_26, %c0_27], %42 {strides = array<i32>} : memref<1x32x32xbf16, #tpu.memory_space<vmem>>, vector<1x32x32xbf16>,
    return
  }
  func.func @transform_0(%arg0: i32, %arg1: i32) -> (i32, i32, i32) {
    %c0_i32 = arith.constant 0 : i32
    %c0_i32_0 = arith.constant 0 : i32
    return %arg0, %arg1, %c0_i32 : i32, i32, i32
  }
  func.func @transform_1(%arg0: i32, %arg1: i32) -> (i32, i32) {
    %c0_i32 = arith.constant 0 : i32
    %c0_i32_0 = arith.constant 0 : i32
    %c0_i32_1 = arith.constant 0 : i32
    return %c0_i32, %c0_i32_0 : i32, i32
  }
  func.func @transform_2(%arg0: i32, %arg1: i32) -> (i32, i32) {
    %c0_i32 = arith.constant 0 : i32
    %c0_i32_0 = arith.constant 0 : i32
    %c0_i32_1 = arith.constant 0 : i32
    return %c0_i32, %c0_i32_0 : i32, i32
  }
  func.func @transform_3(%arg0: i32, %arg1: i32) -> (i32, i32) {
    %c0_i32 = arith.constant 0 : i32
    %c0_i32_0 = arith.constant 0 : i32
    %c0_i32_1 = arith.constant 0 : i32
    return %c0_i32, %c0_i32_0 : i32, i32
  }
  func.func @transform_4(%arg0: i32, %arg1: i32) -> (i32, i32) {
    %c0_i32 = arith.constant 0 : i32
    %c0_i32_0 = arith.constant 0 : i32
    %c0_i32_1 = arith.constant 0 : i32
    return %c0_i32, %c0_i32_0 : i32, i32
  }
  func.func @transform_5(%arg0: i32, %arg1: i32) -> (i32, i32) {
    %c0_i32 = arith.constant 0 : i32
    %c0_i32_0 = arith.constant 0 : i32
    %c0_i32_1 = arith.constant 0 : i32
    return %c0_i32, %c0_i32_0 : i32, i32
  }
  func.func @transform_6(%arg0: i32, %arg1: i32) -> (i32, i32, i32) {
    %c0_i32 = arith.constant 0 : i32
    %c0_i32_0 = arith.constant 0 : i32
    return %arg0, %arg1, %c0_i32 : i32, i32, i32
  }
  func.func @transform_7(%arg0: i32, %arg1: i32) -> (i32, i32, i32) {
    %c0_i32 = arith.constant 0 : i32
    %c0_i32_0 = arith.constant 0 : i32
    return %arg0, %arg1, %c0_i32 : i32, i32, i32
  }
  func.func @transform_8(%arg0: i32, %arg1: i32) -> (i32, i32, i32) {
    %c0_i32 = arith.constant 0 : i32
    %c0_i32_0 = arith.constant 0 : i32
    return %arg0, %arg1, %c0_i32 : i32, i32, i32
  }
}

</mosaic_0001>

<bundles_post_ra>
// kernel: tpu_custom_call.1
= control target key start
LH: loop header
LB: loop body
LE: loop exit
PB: predicated region body
PF: predicated region fallthrough
CT: control target
= control target key end

     0   :  { %s1033_s27 = smov 0   ;;  %s1035_s28 = smov 0   ;;  %s1170_s0 = inlined_call_operand.vmem [shape: f32[2,64,32], index: 0, kind: input, shape index: {}]   ;;  %s1171_s1 = inlined_call_operand.vmem [shape: f32[1,32], index: 1, kind: input, shape index: {}]   ;;  %s1172_s2 = inlined_call_operand.vmem [shape: f32[1,32], index: 2, kind: input, shape index: {}]   ;;  %s1173_s3 = inlined_call_operand.vmem [shape: bf16[32,32], index: 3, kind: input, shape index: {}]   ;;  %s1174_s4 = inlined_call_operand.vmem [shape: bf16[32,32], index: 4, kind: input, shape index: {}]   ;;  %s1175_s5 = inlined_call_operand.vmem [shape: bf16[32,32], index: 5, kind: input, shape index: {}]   ;;  %s1176_s6 = inlined_call_operand.vmem [shape: bf16[2,64,32], index: 6, kind: output, shape index: {0}]   ;;  %s1177_s7 = inlined_call_operand.vmem [shape: bf16[2,64,32], index: 7, kind: output, shape index: {1}]   ;;  %s1178_s8 = inlined_call_operand.vmem [shape: bf16[2,64,32], index: 8, kind: output, shape index: {2}]  }
   0x1   :  { %s1037_s29 = smov 0   ;;  %s1039_s30 = smov 0  }
   0x2   :  { %s1041_s9 = smov 0  }
   0x3 LB: > { %s28_s10 = sadd.s32 1, %s977_s29  ;;  %s31_s11 = sadd.s32 1, %s981_s30  ;;  %s985_s9 = sphi %s1041_s9, %s19_s9   ;;  %s981_s30 = sphi %s1039_s30, %s1182_s30   ;;  %s977_s29 = sphi %s1037_s29, %s1181_s29   ;;  %s973_s28 = sphi %s1035_s28, %s1180_s28   ;;  %s969_s27 = sphi %s1033_s27, %s1179_s27  }
   0x4   : > { %p29_p0 = scmp.ge.s32.totalorder %s28_s10, 2  ;;  %p841_p1 = scmp.ge.s32.totalorder %s985_s9, 1 }
   0x5   : > { %p292_p2 = scmp.lt.s32.totalorder %s985_s9, 5 }
   0x6   : > { %s1184_s10 = smov (%p29_p0, %s28_s10), 0  ;;  %s1186_s11 = smov (!%p29_p0, %s31_s11), %s981_s30 }
   0x7   : > { %p293_p3 = pnand %p841_p1, %p292_p2  ;;  %p33_p4 = scmp.ge.s32.totalorder %s1186_s11, 2 }
   0x8   : > { %s842_s12 = sshll.u32 (!%p293_p3), %s969_s27, 2  ;;  %p353_p5 = scmp.lt.s32.totalorder (!%p293_p3), %s973_s28, 1 }
   0x9   : > { %s1188_s11 = smov (%p33_p4, %s1186_s11), 0  ;;  %296 = sbr.rel (%p293_p3) target bundleno = 459 (0x1cb), region = 44 }
   0xa   : > { %p355_p6 = scmp.lt.s32.totalorder (!%p293_p3), %s842_s12, 7 }
   0xe   : > { %s1190_s28 = smov (!%p353_p5, %s973_s28), 1  ;;  %s1192_s12 = smov (!%p355_p6, %s842_s12), 7  ;;  %vm397_vm0 = vcmask 261120   ;;  %v987_v8 = vmov 32.0   ;;  %v887_v35 = vld [vmem:[%s1173_s3 + $0x8] sm:$0xff]  ;;  %v886_v42 = vld [vmem:[%s1173_s3] sm:$0xff] }
   0xf   : > { %s843_s13 = sshll.u32 %s1190_s28, 3  ;;  %937 = vrcp.f32 %v987_v8  ;;  %v889_v36 = vld [vmem:[%s1174_s4 + $0x8] sm:$0xff]  ;;  %539 = vmatpush.bf16.msra.mxu0 %v887_v35  ;;  %892 = vmatpush.bf16.msra.mxu3 %v887_v35  ;;  %v888_v43 = vld [vmem:[%s1174_s4] sm:$0xff]  ;;  %vm556_vm14 = vcmask 257024  }
  0x10   : > { %s1063_s14 = sadd.s32 %s843_s13, %s1192_s12  ;;  %v891_v37 = vld [vmem:[%s1175_s5 + $0x8] sm:$0xff]  ;;  %583 = vmatpush.bf16.msra.mxu1 %v889_v36  ;;  %v890_v44 = vld [vmem:[%s1175_s5] sm:$0xff] }
  0x11   : > { %s844_s15 = sshll.u32 %s1063_s14, 3  ;;  %626 = vmatpush.bf16.msra.mxu2 %v891_v37  ;;  %s847_s19 = sshll.u32 %s1063_s14, 2 }
  0x12   : > { %s360_s18 = scalar_lea.vmem %s1170_s0, %s844_s15  ;;  %s370_s22 = scalar_lea.vmem %s1176_s6, %s847_s19 }
  0x13   : > { %v395_v0 = vld [vmem:[%s360_s18 + $0x10] sm:$0xff]  ;;  %v393_v1 = vld [vmem:[%s360_s18] sm:$0xff]  ;;  %v396_v4 = vld [vmem:[%s360_s18 + $0x18] sm:$0xff]  ;;  %540 = vmatpush.bf16.msra.mxu0 %v886_v42  ;;  %893 = vmatpush.bf16.msra.mxu3 %v886_v42  ;;  %s1134_s25 = scalar_lea.vmem %s1177_s7, %s847_s19  ;;  %s390_s27 = scalar_lea.vmem %s1178_s8, %s847_s19 }
  0x14   : > { %v404_v2 = vsel %vm397_vm0, %v395_v0, 0.0  ;;  %v398_v3 = vsel %vm397_vm0, %v393_v1, 0.0  ;;  %v394_v5 = vld [vmem:[%s360_s18 + $0x8] sm:$0xff]  ;;  %v407_v6 = vsel %vm397_vm0, %v396_v4, 0.0  ;;  %584 = vmatpush.bf16.msra.mxu1 %v888_v43 }
  0x15   : > { %405 = vadd.xlane.f32.xlu1 %v404_v2  ;;  %399 = vadd.xlane.f32.xlu0 %v398_v3  ;;  %v401_v7 = vsel %vm397_vm0, %v394_v5, 0.0  ;;  %v938_v9 = vpop.eup %937 }
  0x16   : > { %v411_v10 = vmul.f32 32.0, %v938_v9  ;;  %vm415_vm1 = vweird.f32 %v938_v9  ;;  %627 = vmatpush.bf16.msra.mxu2 %v890_v44 }
  0x18   : > { %v412_v11 = vsub.f32 1.0, %v411_v10 }
  0x1a   : > { %v413_v12 = vmul.f32 %v938_v9, %v412_v11 }
  0x1c   : > { %v414_v13 = vadd.f32 %v938_v9, %v413_v12 }
  0x1d   : > { %408 = vadd.xlane.f32.xlu1 %v407_v6  ;;  %402 = vadd.xlane.f32.xlu0 %v401_v7 }
  0x1e   : > { %v416_v14 = vsel %vm415_vm1, %v938_v9, %v414_v13 }
  0x88   : > { %v406_v15 = vpop.xlane.xlu1 %405  ;;  %v400_v16 = vpop.xlane.xlu0 %399 }
  0x89   : > { %v419_v17 = vmul.f32 %v416_v14, %v406_v15  ;;  %v417_v18 = vmul.f32 %v416_v14, %v400_v16 }
  0x8b   : > { %v1073_v19 = vsub.f32 %v395_v0, %v419_v17  ;;  %v1075_v20 = vsub.f32 %v393_v1, %v417_v18 }
  0x8d   : > { %v427_v21 = vmul.f32 %v1073_v19, %v1073_v19  ;;  %v425_v22 = vmul.f32 %v1075_v20, %v1075_v20 }
  0x8f   : > { %v435_v23 = vsel %vm397_vm0, %v427_v21, 0.0  ;;  %v429_v24 = vsel %vm397_vm0, %v425_v22, 0.0 }
  0x90   : > { %v409_v25 = vpop.xlane.xlu1 %408  ;;  %436 = vadd.xlane.f32.xlu0 %v435_v23  ;;  %430 = vadd.xlane.f32.xlu2 %v429_v24  ;;  %v403_v26 = vpop.xlane.xlu0 %402 }
  0x91   : > { %v420_v27 = vmul.f32 %v416_v14, %v409_v25  ;;  %v418_v28 = vmul.f32 %v416_v14, %v403_v26 }
  0x93   : > { %v1083_v29 = vsub.f32 %v396_v4, %v420_v27  ;;  %v1085_v30 = vsub.f32 %v394_v5, %v418_v28 }
  0x95   : > { %v428_v31 = vmul.f32 %v1083_v29, %v1083_v29  ;;  %v426_v32 = vmul.f32 %v1085_v30, %v1085_v30 }
  0x97   : > { %v438_v33 = vsel %vm397_vm0, %v428_v31, 0.0  ;;  %v432_v34 = vsel %vm397_vm0, %v426_v32, 0.0 }
  0x98   : > { %439 = vadd.xlane.f32.xlu1 %v438_v33  ;;  %433 = vadd.xlane.f32.xlu2 %v432_v34 }
 0x103   : > { %v431_v38 = vpop.xlane.xlu2 %430  ;;  %v437_v39 = vpop.xlane.xlu0 %436 }
 0x104   : > { %v441_v40 = vmul.f32 %v431_v38, %v416_v14  ;;  %v443_v41 = vmul.f32 %v437_v39, %v416_v14 }
 0x106   : > { %v445_v45 = vadd.f32 1e-05, %v441_v40  ;;  %v447_v46 = vadd.f32 1e-05, %v443_v41 }
 0x108   : > { %939 = vrsqrt.f32 %v445_v45  ;;  %vm475_vm2 = vweird.f32 %v447_v46  ;;  %vm455_vm6 = vweird.f32 %v445_v45 }
 0x109   : > { %941 = vrsqrt.f32 %v447_v46 }
 0x10b   : > { %v440_v47 = vpop.xlane.xlu1 %439  ;;  %v434_v48 = vpop.xlane.xlu2 %433 }
 0x10c   : > { %v444_v49 = vmul.f32 %v440_v47, %v416_v14  ;;  %v442_v50 = vmul.f32 %v434_v48, %v416_v14  ;;  %v935_v14 = vld [vmem:[%s1171_s1] ss:$0 sm:$0xff] }
 0x10e   : > { %v940_v51 = vpop.eup %939  ;;  %v448_v52 = vadd.f32 1e-05, %v444_v49  ;;  %v446_v53 = vadd.f32 1e-05, %v442_v50 }
 0x10f   : > { %v942_v54 = vpop.eup %941  ;;  %v450_v55 = vmul.f32 %v940_v51, %v445_v45  ;;  %vm456_vm4 = vweird.f32 %v940_v51 }
 0x110   : > { %v470_v56 = vmul.f32 %v942_v54, %v447_v46  ;;  %943 = vrsqrt.f32 %v448_v52  ;;  %vm476_vm3 = vweird.f32 %v942_v54  ;;  %vm457_vm7 = vmor %vm455_vm6, %vm456_vm4  ;;  %vm485_vm8 = vweird.f32 %v448_v52 }
 0x111   : > { %v451_v57 = vmul.f32 %v940_v51, %v450_v55  ;;  %945 = vrsqrt.f32 %v446_v53  ;;  %vm477_vm5 = vmor %vm475_vm2, %vm476_vm3  ;;  %vm465_vm12 = vweird.f32 %v446_v53 }
 0x112   : > { %v471_v58 = vmul.f32 %v942_v54, %v470_v56 }
 0x113   : > { %v452_v59 = vmul.f32 0.5, %v451_v57 }
 0x114   : > { %v472_v60 = vmul.f32 0.5, %v471_v58 }
 0x115   : > { %v453_v61 = vsub.f32 1.5, %v452_v59 }
 0x116   : > { %v944_v62 = vpop.eup %943  ;;  %v473_v63 = vsub.f32 1.5, %v472_v60 }
 0x117   : > { %v946_v0 = vpop.eup %945  ;;  %v480_v1 = vmul.f32 %v944_v62, %v448_v52  ;;  %v454_v2 = vmul.f32 %v940_v51, %v453_v61  ;;  %vm486_vm9 = vweird.f32 %v944_v62 }
 0x118   : > { %v474_v3 = vmul.f32 %v942_v54, %v473_v63  ;;  %v460_v4 = vmul.f32 %v946_v0, %v446_v53  ;;  %vm487_vm10 = vmor %vm485_vm8, %vm486_vm9  ;;  %vm466_vm11 = vweird.f32 %v946_v0 }
 0x119   : > { %v481_v5 = vmul.f32 %v944_v62, %v480_v1  ;;  %v458_v9 = vsel %vm457_vm7, %v940_v51, %v454_v2  ;;  %vm467_vm13 = vmor %vm465_vm12, %vm466_vm11 }
 0x11a   : > { %v461_v6 = vmul.f32 %v946_v0, %v460_v4  ;;  %v478_v7 = vsel %vm477_vm5, %v942_v54, %v474_v3  ;;  %v489_v15 = vmul.f32 %v458_v9, %v1075_v20 }
 0x11b   : > { %v482_v8 = vmul.f32 0.5, %v481_v5  ;;  %v491_v12 = vmul.f32 %v478_v7, %v1073_v19  ;;  %v936_v19 = vld [vmem:[%s1172_s2] ss:$0 sm:$0xff] }
 0x11c   : > { %v462_v10 = vmul.f32 0.5, %v461_v6  ;;  %v497_v25 = vmul.f32 %v935_v14, %v489_v15 }
 0x11d   : > { %v483_v11 = vsub.f32 1.5, %v482_v8  ;;  %v499_v23 = vmul.f32 %v935_v14, %v491_v12 }
 0x11e   : > { %v463_v13 = vsub.f32 1.5, %v462_v10  ;;  %v505_v31 = vadd.f32 %v936_v19, %v497_v25 }
 0x11f   : > { %v484_v16 = vmul.f32 %v944_v62, %v483_v11  ;;  %v507_v20 = vadd.f32 %v936_v19, %v499_v23 }
 0x120   : > { %v464_v17 = vmul.f32 %v946_v0, %v463_v13 }
 0x121   : > { %v488_v18 = vsel %vm487_vm10, %v944_v62, %v484_v16 }
 0x122   : > { %v492_v21 = vmul.f32 %v488_v18, %v1083_v29  ;;  %v468_v22 = vsel %vm467_vm13, %v946_v0, %v464_v17 }
 0x123   : > { %v490_v24 = vmul.f32 %v468_v22, %v1085_v30 }
 0x124   : > { %v500_v26 = vmul.f32 %v935_v14, %v492_v21 }
 0x125   : > { %v498_v27 = vmul.f32 %v935_v14, %v490_v24 }
 0x126   : > { %v508_v28 = vadd.f32 %v936_v19, %v500_v26 }
 0x127   : > { %v506_v32 = vadd.f32 %v936_v19, %v498_v27 }
 0x128   : > { %v510_v33 = vpack.c.bf16 %v508_v28, %v507_v20 }
 0x129   : > { %v509_v34 = vpack.c.bf16 %v506_v32, %v505_v31 }
 0x12a   : > { %863 = vmatmul.msk.bf16.vlgmr.msra.gmra.mxu3 %vm397_vm0, %v510_v33 }
 0x12b   : > { %862 = vmatmul.msk.bf16.vlgmr.msra.gmra.mxu0 %vm397_vm0, %v509_v34  ;;  %872 = vmatmul.msk.bf16.vlgmr.msra.gmra.mxu1 %vm397_vm0, %v509_v34 }
 0x12c   : > { %882 = vmatmul.msk.bf16.vlgmr.msra.gmra.mxu2 %vm397_vm0, %v509_v34 }
 0x13b   : > { %873 = vmatmul.msk.bf16.gmra.mxu1 %vm397_vm0, %v510_v33 }
 0x13c   : > { %883 = vmatmul.msk.bf16.gmra.mxu2 %vm397_vm0, %v510_v33 }
 0x1a8   : > { %v542_v29 = vpop.f32.mrf.mxu0  ;;  %v586_v30 = vpop.f32.mrf.mxu1 }
 0x1a9   : > { %v552_v35 = vpack.c.bf16 %v542_v29, %v542_v29  ;;  %v596_v36 = vpack.c.bf16 %v586_v30, %v586_v30 }
 0x1ab   : > { %557 = vst.msk [vmem:[%s370_s22] sm:$0xf] %vm556_vm14, %v552_v35 }
 0x1ac   : > { %600 = vst.msk [vmem:[%s1134_s25] sm:$0xf] %vm556_vm14, %v596_v36 }
 0x1ad   : > { %v547_v37 = vpop.f32.mrf.mxu3 }
 0x1ae   : > { %v554_v38 = vpack.c.bf16 %v547_v37, %v547_v37 }
 0x1af   : > { %v629_v39 = vpop.f32.mrf.mxu2 }
 0x1b0   : > { %559 = vst.msk [vmem:[%s370_s22 + $0x8] sm:$0xf] %vm556_vm14, %v554_v38  ;;  %v639_v40 = vpack.c.bf16 %v629_v39, %v629_v39  ;;  %v544_v41 = vpop.f32.mrf.mxu0  ;;  %v588_v42 = vpop.f32.mrf.mxu1 }
 0x1b1   : > { %v553_v43 = vpack.c.bf16 %v544_v41, %v544_v41  ;;  %v597_v44 = vpack.c.bf16 %v588_v42, %v588_v42 }
 0x1b2   : > { %643 = vst.msk [vmem:[%s390_s27] sm:$0xf] %vm556_vm14, %v639_v40 }
 0x1b3   : > { %558 = vst.msk [vmem:[%s370_s22 + $0x4] sm:$0xf] %vm556_vm14, %v553_v43 }
 0x1b4   : > { %601 = vst.msk [vmem:[%s1134_s25 + $0x4] sm:$0xf] %vm556_vm14, %v597_v44 }
 0x1b5   : > { %v549_v45 = vpop.f32.mrf.mxu3 }
 0x1b6   : > { %v555_v46 = vpack.c.bf16 %v549_v45, %v549_v45 }
 0x1b7   : > { %v631_v47 = vpop.f32.mrf.mxu2 }
 0x1b8   : > { %560 = vst.msk [vmem:[%s370_s22 + $0xc] sm:$0xf] %vm556_vm14, %v555_v46  ;;  %v640_v48 = vpack.c.bf16 %v631_v47, %v631_v47  ;;  %v591_v49 = vpop.f32.mrf.mxu1 }
 0x1b9   : > { %v598_v50 = vpack.c.bf16 %v591_v49, %v591_v49 }
 0x1ba   : > { %644 = vst.msk [vmem:[%s390_s27 + $0x4] sm:$0xf] %vm556_vm14, %v640_v48 }
 0x1bb   : > { %602 = vst.msk [vmem:[%s1134_s25 + $0x8] sm:$0xf] %vm556_vm14, %v598_v50 }
 0x1bf   : > { %v634_v51 = vpop.f32.mrf.mxu2 }
 0x1c0   : > { %v641_v52 = vpack.c.bf16 %v634_v51, %v634_v51  ;;  %v593_v53 = vpop.f32.mrf.mxu1 }
 0x1c1   : > { %v599_v54 = vpack.c.bf16 %v593_v53, %v593_v53 }
 0x1c2   : > { %645 = vst.msk [vmem:[%s390_s27 + $0x8] sm:$0xf] %vm556_vm14, %v641_v52 }
 0x1c3   : > { %603 = vst.msk [vmem:[%s1134_s25 + $0xc] sm:$0xf] %vm556_vm14, %v599_v54 }
 0x1c7   : > { %v636_v55 = vpop.f32.mrf.mxu2 }
 0x1c8   : > { %v642_v56 = vpack.c.bf16 %v636_v55, %v636_v55 }
 0x1ca   : > { %646 = vst.msk [vmem:[%s390_s27 + $0xc] sm:$0xf] %vm556_vm14, %v642_v56 }
 0x1cb PF: > { %s19_s9 = sadd.s32 1, %s985_s9   ;;  %s1179_s27 = smov %s977_s29 }
 0x1cc   : > { %p16_p7 = scmp.ge.s32.totalorder %s19_s9, 6   ;;  %s1180_s28 = smov %s981_s30 }
 0x1cd   : > { %s1181_s29 = smov %s1184_s10  ;;  %s1182_s30 = smov %s1188_s11 }
 0x1ce   :  { %18 = sbr.rel (!%p16_p7) target bundleno = 3 (0x3), region = 98 }

</bundles_post_ra>
